<compile_context>
chip_gen: v6e
topology: v6e:2x2x1
jax: 0.10.0
libtpu: 0.0.40
codegen_flags: <defaults>
</compile_context>

<pallas_src>
import functools
import math

import jax
import jax.numpy as jnp
from jax.experimental import pallas as pl
from jax.experimental.pallas import tpu as pltpu


# -----------------------------------------------------------------------------
# Small helpers: VMEM budget, tiling, single-buffering probe
# -----------------------------------------------------------------------------
def _vmem_budget_bytes():
    """Scoped-VMEM budget used for tile sizing AND CompilerParams.

    Queried from the device when possible (v5e/v6e: 128 MiB, v7x: 64 MiB per
    TensorCore); conservative 64 MiB fallback.  75% leaves headroom for
    Mosaic-internal scratch."""
    try:
        cap = int(pltpu.get_tpu_info().vmem_capacity_bytes)
    except Exception:
        cap = 64 * 1024 * 1024
    return int(cap * 3 // 4)


def _row_tile(num_rows, max_rows):
    """Biggest legal row tile <= max_rows (full extent, else 256/8-multiple)."""
    if num_rows <= max_rows:
        return num_rows                       # full extent is always a legal block
    if max_rows >= 256:
        return (max_rows // 256) * 256        # keep M >= 256 to fill the MXU
    return max(8, (max_rows // 8) * 8)


def _copy_kernel(x_ref, o_ref):
    o_ref[...] = x_ref[...]


@functools.lru_cache(maxsize=None)
def _single_buffering_supported():
    """Probe whether this JAX/Mosaic build accepts pl.Buffered(1) on a
    grid-invariant BlockSpec (halves VMEM for resident operands)."""
    try:
        fn = pl.pallas_call(
            _copy_kernel,
            out_shape=jax.ShapeDtypeStruct((8, 128), jnp.float32),
            grid=(1,),
            in_specs=[pl.BlockSpec((8, 128), lambda i: (0, 0),
                                   pipeline_mode=pl.Buffered(1))],
            out_specs=pl.BlockSpec((8, 128), lambda i: (0, 0)),
        )
        jax.block_until_ready(fn(jnp.zeros((8, 128), jnp.float32)))
        return True
    except Exception:
        return False


def _resident_spec(block_shape, index_map):
    """BlockSpec for a constant-index (grid-invariant) operand: it stays
    resident in VMEM, so request single buffering when supported."""
    if _single_buffering_supported():
        return pl.BlockSpec(block_shape, index_map, pipeline_mode=pl.Buffered(1))
    return pl.BlockSpec(block_shape, index_map)


# -----------------------------------------------------------------------------
# Kernels
# -----------------------------------------------------------------------------
def _layernorm_kernel(x_ref, g_ref, b_ref, o_ref, *, eps, d):
    """LayerNorm over the last (lane) axis of a (Tr, D) row tile."""
    x = x_ref[...].astype(jnp.float32)                                  # (Tr, D)
    mean = jnp.mean(x, axis=-1, keepdims=True)
    xc = x - mean
    # torch.Tensor.std default is unbiased -> divide by (D - 1)
    var = jnp.sum(xc * xc, axis=-1, keepdims=True) * (1.0 / (d - 1))
    # One exact reciprocal per row (EUP) instead of D divides per row (VPU).
    inv = pl.reciprocal(jnp.sqrt(var) + eps, approx=False)              # (Tr, 1)
    o_ref[...] = (g_ref[...] * (xc * inv) + b_ref[...]).astype(o_ref.dtype)


def _fused_ln_linear_residual_kernel(x_ref, g_ref, b_ref, w_ref, wb_ref, o_ref,
                                     normed_ref, *, eps, d, tn):
    """Fused fast path: out[:, n] = x[:, n] + LayerNorm(x) @ W_T[:, n] + b[n].

    Grid = (row tiles, output-column tiles).  The (tr, D) x tile stays resident
    across the n axis; LayerNorm runs once (n == 0) into the bf16 `normed`
    scratch, then each step streams one (D, tn) bf16 weight block through the
    MXU with f32 accumulation."""
    n = pl.program_id(1)

    @pl.when(n == 0)
    def _():
        x = x_ref[...].astype(jnp.float32)                              # (Tr, D)
        mean = jnp.mean(x, axis=-1, keepdims=True)
        xc = x - mean
        var = jnp.sum(xc * xc, axis=-1, keepdims=True) * (1.0 / (d - 1))
        inv = pl.reciprocal(jnp.sqrt(var) + eps, approx=False)          # (Tr, 1)
        normed = g_ref[...] * (xc * inv) + b_ref[...]
        normed_ref[...] = normed.astype(normed_ref.dtype)               # bf16 for MXU

    # bf16 x bf16 matmul, f32 accumulation (MXU-native on v5e/v6e/v7x).
    y = jnp.dot(normed_ref[...], w_ref[...], preferred_element_type=jnp.float32)
    y = y + wb_ref[...].astype(jnp.float32)

    # Residual: matching columns sliced from the resident x tile.
    start = pl.multiple_of(n * tn, tn)
    x_cols = x_ref[:, pl.ds(start, tn)].astype(jnp.float32)
    o_ref[...] = (x_cols + y).astype(o_ref.dtype)


# -----------------------------------------------------------------------------
# Wrappers
# -----------------------------------------------------------------------------
def layer_norm(x, a_2, b_2, *, eps=1e-6, out_dtype=None):
    """Pallas LayerNorm.  `out_dtype=jnp.bfloat16` halves the writeback (and the
    sublayer's re-read) when the sublayer computes in bf16."""
    d = x.shape[-1]
    out_dtype = jnp.dtype(x.dtype if out_dtype is None else out_dtype)
    x2 = x.reshape(-1, d)
    r = x2.shape[0]

    budget = _vmem_budget_bytes()
    # Double-buffered input + output row tiles dominate VMEM.
    per_row = 2 * d * x2.dtype.itemsize + 2 * d * out_dtype.itemsize
    max_tr = max(8, (budget - (1 << 20)) // per_row)
    tr = _row_tile(r, min(max_tr, 1024))
    steps = pl.cdiv(r, tr)

    row_spec = pl.BlockSpec((tr, d), lambda i: (i, 0))
    vec_spec = _resident_spec((1, d), lambda i: (0, 0))

    out = pl.pallas_call(
        functools.partial(_layernorm_kernel, eps=eps, d=d),
        out_shape=jax.ShapeDtypeStruct((r, d), out_dtype),
        grid_spec=pltpu.PrefetchScalarGridSpec(
            num_scalar_prefetch=0,
            grid=(steps,),
            in_specs=[row_spec, vec_spec, vec_spec],
            out_specs=pl.BlockSpec((tr, d), lambda i: (i, 0)),
        ),
        compiler_params=pltpu.CompilerParams(
            dimension_semantics=("parallel",),
            vmem_limit_bytes=budget),
    )(x2, a_2.reshape(1, d), b_2.reshape(1, d))
    return out.reshape(x.shape[:-1] + (d,))


def sublayer_connection(x, a_2, b_2, sublayer, *, eps=1e-6, ln_out_dtype=None):
    """Generic SublayerConnection: x + dropout(sublayer(LayerNorm(x))).

    `sublayer` is an arbitrary JAX callable, so it runs as plain JAX after the
    Pallas LayerNorm.  The residual add is intentionally left in plain JAX so
    XLA fuses it into the sublayer's epilogue (no extra HBM round trip)."""
    # TODO(synk): dropout is treated as eval-mode identity (no in-kernel RNG masking).
    normed = layer_norm(x, a_2, b_2, eps=eps, out_dtype=ln_out_dtype)
    return x + sublayer(normed)


def sublayer_connection_fused_linear(x, a_2, b_2, w_t, w_bias, *, eps=1e-6):
    """Fused fast path for the common case sublayer = nn.Linear(D, D).

    `w_t` is the weight PRE-TRANSPOSED to (in, out) at init time (ideally also
    pre-cast to bf16); `w_bias` is (out,)."""
    d = x.shape[-1]
    assert w_t.shape == (d, d), "fused path assumes a square Linear(D, D) sublayer"
    w_t = w_t.astype(jnp.bfloat16)            # no-op when pre-cast at init time
    x2 = x.reshape(-1, d)
    r = x2.shape[0]
    out_dtype = jnp.dtype(x.dtype)

    # Output-column tile: 256-multiple when D allows (fills the 256x256 MXU on
    # v6e/v7x); the DxD weight is streamed as (D, tn) blocks, never fully resident.
    if d % 512 == 0:
        tn = 512
    elif d % 256 == 0:
        tn = 256
    elif d % 128 == 0:
        tn = 128
    else:
        tn = d
    ncols = pl.cdiv(d, tn)

    budget = _vmem_budget_bytes()
    # Fixed: double-buffered bf16 weight block + bias/gamma/beta + slack.
    fixed = 2 * d * tn * 2 + 2 * tn * 4 + 4 * d * 4 + (1 << 20)
    # Per-row: dbl-buffered x tile (f32) + bf16 normed scratch + dbl-buffered out tile.
    per_row = 2 * d * x2.dtype.itemsize + d * 2 + 2 * tn * out_dtype.itemsize
    max_tr = max(8, (budget - fixed) // per_row)
    tr = _row_tile(r, min(max_tr, 1024))
    nrows = pl.cdiv(r, tr)

    x_spec = pl.BlockSpec((tr, d), lambda i, n: (i, 0))       # resident across n
    g_spec = _resident_spec((1, d), lambda i, n: (0, 0))
    b_spec = _resident_spec((1, d), lambda i, n: (0, 0))
    w_spec = pl.BlockSpec((d, tn), lambda i, n: (0, n))       # streamed weight columns
    wb_spec = pl.BlockSpec((1, tn), lambda i, n: (0, n))
    o_spec = pl.BlockSpec((tr, tn), lambda i, n: (i, n))

    out = pl.pallas_call(
        functools.partial(_fused_ln_linear_residual_kernel, eps=eps, d=d, tn=tn),
        out_shape=jax.ShapeDtypeStruct((r, d), out_dtype),
        grid_spec=pltpu.PrefetchScalarGridSpec(
            num_scalar_prefetch=0,
            grid=(nrows, ncols),
            in_specs=[x_spec, g_spec, b_spec, w_spec, wb_spec],
            out_specs=o_spec,
            scratch_shapes=[pltpu.VMEM((tr, d), jnp.bfloat16)],   # LN result, reused over n
        ),
        compiler_params=pltpu.CompilerParams(
            dimension_semantics=("parallel", "arbitrary"),
            vmem_limit_bytes=budget),
    )(x2, a_2.reshape(1, d), b_2.reshape(1, d), w_t, w_bias.reshape(1, d))
    return out.reshape(x.shape)


# -----------------------------------------------------------------------------
# Pure-JAX reference mirroring the PyTorch forward (eval mode)
# -----------------------------------------------------------------------------
def _reference_sublayer_connection(x, a_2, b_2, sublayer, eps=1e-6):
    mean = jnp.mean(x, axis=-1, keepdims=True)
    var = jnp.sum((x - mean) ** 2, axis=-1, keepdims=True) / (x.shape[-1] - 1)
    std = jnp.sqrt(var)
    normed = a_2 * (x - mean) / (std + eps) + b_2
    return x + sublayer(normed)   # dropout: eval-mode identity


if __name__ == "__main__":
    key = jax.random.PRNGKey(0)
    ks = jax.random.split(key, 5)

    # Small demo shapes per the task spec (D=128 keeps the feature dim lane-dense).
    # NOTE: perf levers (tiling / MXU / bandwidth) only show up at rows>=8K, D>=1024.
    B, S, D = 2, 8, 128
    x = jax.random.normal(ks[0], (B, S, D), dtype=jnp.float32)

    # LayerNorm params (module inits ones/zeros; perturb so the test is meaningful).
    a_2 = 1.0 + 0.1 * jax.random.normal(ks[1], (D,), jnp.float32)
    b_2 = 0.1 * jax.random.normal(ks[2], (D,), jnp.float32)

    # Demo sublayer: Linear(D, D) with PyTorch (out, in) weight layout.
    bound = 1.0 / math.sqrt(D)
    w = jax.random.uniform(ks[3], (D, D), jnp.float32, -bound, bound)
    w_bias = jax.random.uniform(ks[4], (D,), jnp.float32, -bound, bound)
    w_t = w.T                              # pre-transposed ONCE at init time
    w_t_bf16 = w_t.astype(jnp.bfloat16)    # pre-cast ONCE at init time (bf16-native MXU)

    def sublayer(t):
        # HIGHEST precision so the generic-path comparison is rounding-stable.
        return jnp.dot(t, w_t, precision=jax.lax.Precision.HIGHEST) + w_bias

    ref = _reference_sublayer_connection(x, a_2, b_2, sublayer)

    # Generic path: Pallas LayerNorm -> JAX sublayer -> JAX residual add (fused by XLA).
    out_generic = jax.block_until_ready(sublayer_connection(x, a_2, b_2, sublayer))
    assert out_generic.shape == (B, S, D)
    assert jnp.allclose(out_generic, ref, atol=1e-4, rtol=1e-4), \
        "generic SublayerConnection mismatch vs reference"

    # Generic path with bf16 hand-off from the LN kernel to a bf16 sublayer
    # (halves LN writeback + sublayer re-read).  Tolerance re-baselined for bf16.
    def sublayer_bf16(t):
        return jnp.dot(t, w_t_bf16, preferred_element_type=jnp.float32) + w_bias

    out_bf16 = jax.block_until_ready(
        sublayer_connection(x, a_2, b_2, sublayer_bf16, ln_out_dtype=jnp.bfloat16))
    assert out_bf16.shape == (B, S, D)
    assert jnp.allclose(out_bf16, ref, atol=3e-2, rtol=3e-2), \
        "bf16-handoff SublayerConnection mismatch vs reference"

    # Fused single-kernel fast path (linear sublayer).  Tolerance documents the
    # expected bf16-weight/activation error (f32 accumulation) vs the f32
    # HIGHEST-precision reference.
    out_fused = jax.block_until_ready(
        sublayer_connection_fused_linear(x, a_2, b_2, w_t_bf16, w_bias))
    assert out_fused.shape == (B, S, D)
    assert jnp.allclose(out_fused, ref, atol=3e-2, rtol=3e-2), \
        "fused SublayerConnection mismatch vs reference"

    print("KERNEL_OK")
</pallas_src>

<mosaic_0001>
module attributes {stable_mosaic.version = 11 : i64} {
  func.func @_copy_kernel(%arg0: i32, %arg1: memref<8x128xf32, #tpu.memory_space<vmem>>, %arg2: memref<8x128xf32, #tpu.memory_space<vmem>>) attributes {dimension_semantics = [#tpu.dimension_semantics<arbitrary>], iteration_bounds = array<i64: 1>, scalar_prefetch = 0 : i64, scratch_operands = 0 : i64, tpu.core_type = #tpu.core_type<tc>, window_params = [{pipeline_mode = #tpu.pipeline_mode<synchronous>, transform_indices = @transform_0, window_bounds = array<i64: 8, 128>}, {pipeline_mode = #tpu.pipeline_mode<synchronous>, transform_indices = @transform_1, window_bounds = array<i64: 8, 128>}]} {
    %c0 = arith.constant 0 : index
    %c0_0 = arith.constant 0 : index
    %0 = vector.load %arg1[%c0, %c0_0] : memref<8x128xf32, #tpu.memory_space<vmem>>, vector<8x128xf32>
    %c0_1 = arith.constant 0 : index
    %c0_2 = arith.constant 0 : index
    %1 = vector.load %arg2[%c0_1, %c0_2] : memref<8x128xf32, #tpu.memory_space<vmem>>, vector<8x128xf32>
    tpu.vector_store %arg2[%c0_1, %c0_2], %0 {strides = array<i32>} : memref<8x128xf32, #tpu.memory_space<vmem>>, vector<8x128xf32>,
    return
  }
  func.func @transform_0(%arg0: i32) -> (i32, i32) {
    %c0_i32 = arith.constant 0 : i32
    %c0_i32_0 = arith.constant 0 : i32
    %c0_i32_1 = arith.constant 0 : i32
    return %c0_i32, %c0_i32_0 : i32, i32
  }
  func.func @transform_1(%arg0: i32) -> (i32, i32) {
    %c0_i32 = arith.constant 0 : i32
    %c0_i32_0 = arith.constant 0 : i32
    %c0_i32_1 = arith.constant 0 : i32
    return %c0_i32, %c0_i32_0 : i32, i32
  }
}

module attributes {stable_mosaic.version = 11 : i64} {
  func.func @_layernorm_kernel(%arg0: i32, %arg1: memref<16x128xf32, #tpu.memory_space<vmem>>, %arg2: memref<1x128xf32, #tpu.memory_space<vmem>>, %arg3: memref<1x128xf32, #tpu.memory_space<vmem>>, %arg4: memref<16x128xf32, #tpu.memory_space<vmem>>) attributes {dimension_semantics = [#tpu.dimension_semantics<parallel>], iteration_bounds = array<i64: 1>, scalar_prefetch = 0 : i64, scratch_operands = 0 : i64, tpu.core_type = #tpu.core_type<tc>, window_params = [{transform_indices = @transform_0, window_bounds = array<i64: 16, 128>}, {pipeline_mode = #tpu.pipeline_mode<synchronous>, transform_indices = @transform_1, window_bounds = array<i64: 1, 128>}, {pipeline_mode = #tpu.pipeline_mode<synchronous>, transform_indices = @transform_2, window_bounds = array<i64: 1, 128>}, {transform_indices = @transform_3, window_bounds = array<i64: 16, 128>}]} {
    %c0 = arith.constant 0 : index
    %c0_0 = arith.constant 0 : index
    %0 = vector.load %arg1[%c0, %c0_0] : memref<16x128xf32, #tpu.memory_space<vmem>>, vector<16x128xf32>
    %cst = arith.constant dense<0.000000e+00> : vector<16xf32>
    %1 = vector.multi_reduction <add>, %0, %cst [1] : vector<16x128xf32> to vector<16xf32>
    %2 = vector.shape_cast %1 : vector<16xf32> to vector<16x1xf32>
    %cst_1 = arith.constant 1.280000e+02 : f32
    %3 = vector.broadcast %cst_1 : f32 to vector<16x1xf32>
    %4 = arith.divf %2, %3 : vector<16x1xf32>
    %5 = vector.broadcast %4 : vector<16x1xf32> to vector<16x128xf32>
    %6 = arith.subf %0, %5 : vector<16x128xf32>
    %7 = arith.mulf %6, %6 : vector<16x128xf32>
    %cst_2 = arith.constant dense<0.000000e+00> : vector<16xf32>
    %8 = vector.multi_reduction <add>, %7, %cst_2 [1] : vector<16x128xf32> to vector<16xf32>
    %9 = vector.shape_cast %8 : vector<16xf32> to vector<16x1xf32>
    %cst_3 = arith.constant 0.00787401571 : f32
    %10 = vector.broadcast %cst_3 : f32 to vector<16x1xf32>
    %11 = arith.mulf %9, %10 : vector<16x1xf32>
    %12 = math.sqrt %11 : vector<16x1xf32>
    %cst_4 = arith.constant 9.99999997E-7 : f32
    %13 = vector.broadcast %cst_4 : f32 to vector<16x1xf32>
    %14 = arith.addf %12, %13 : vector<16x1xf32>
    %15 = tpu.reciprocal %14 : vector<16x1xf32> -> vector<16x1xf32>
    %c0_5 = arith.constant 0 : index
    %c0_6 = arith.constant 0 : index
    %16 = vector.load %arg2[%c0_5, %c0_6] : memref<1x128xf32, #tpu.memory_space<vmem>>, vector<1x128xf32>
    %17 = vector.broadcast %15 : vector<16x1xf32> to vector<16x128xf32>
    %18 = arith.mulf %6, %17 : vector<16x128xf32>
    %19 = vector.broadcast %16 : vector<1x128xf32> to vector<16x128xf32>
    %20 = arith.mulf %19, %18 : vector<16x128xf32>
    %c0_7 = arith.constant 0 : index
    %c0_8 = arith.constant 0 : index
    %21 = vector.load %arg3[%c0_7, %c0_8] : memref<1x128xf32, #tpu.memory_space<vmem>>, vector<1x128xf32>
    %22 = vector.broadcast %21 : vector<1x128xf32> to vector<16x128xf32>
    %23 = arith.addf %20, %22 : vector<16x128xf32>
    %c0_9 = arith.constant 0 : index
    %c0_10 = arith.constant 0 : index
    %24 = vector.load %arg4[%c0_9, %c0_10] : memref<16x128xf32, #tpu.memory_space<vmem>>, vector<16x128xf32>
    tpu.vector_store %arg4[%c0_9, %c0_10], %23 {strides = array<i32>} : memref<16x128xf32, #tpu.memory_space<vmem>>, vector<16x128xf32>,
    return
  }
  func.func @transform_0(%arg0: i32) -> (i32, i32) {
    %c0_i32 = arith.constant 0 : i32
    %c0_i32_0 = arith.constant 0 : i32
    return %arg0, %c0_i32 : i32, i32
  }
  func.func @transform_1(%arg0: i32) -> (i32, i32) {
    %c0_i32 = arith.constant 0 : i32
    %c0_i32_0 = arith.constant 0 : i32
    %c0_i32_1 = arith.constant 0 : i32
    return %c0_i32, %c0_i32_0 : i32, i32
  }
  func.func @transform_2(%arg0: i32) -> (i32, i32) {
    %c0_i32 = arith.constant 0 : i32
    %c0_i32_0 = arith.constant 0 : i32
    %c0_i32_1 = arith.constant 0 : i32
    return %c0_i32, %c0_i32_0 : i32, i32
  }
  func.func @transform_3(%arg0: i32) -> (i32, i32) {
    %c0_i32 = arith.constant 0 : i32
    %c0_i32_0 = arith.constant 0 : i32
    return %arg0, %c0_i32 : i32, i32
  }
}

</mosaic_0001>

<bundles_post_ra>
// kernel: tpu_custom_call.1
= control target key start
LH: loop header
LB: loop body
LE: loop exit
PB: predicated region body
PF: predicated region fallthrough
CT: control target
= control target key end

     0   :  { %6 = vsyncpa [#allocation3], 0  ;;  %s102_s0 = inlined_call_operand.hbm [shape: f32[8,128], index: 0, kind: input, shape index: {}]   ;;  %s103_s1 = inlined_call_operand.hbm [shape: f32[8,128], index: 1, kind: output, shape index: {}]  }
   0x1   :  { %7 = vsyncpa [#allocation4], 0  ;;  %s84_s6 = smov [#allocation2]  }
   0x2   :  { %s14_s7 = sshll.u32 %s84_s6, 4  ;;  %s15_s7 = int_to_ptr.vmem [resolvable:$true] %s14_s7 }
   0x3   :  { %s48_s8 = scalar_lea.vmem %s15_s7, 128  ;;  %p53_p1 = scmp.lt.s32.totalorder %s15_s7, %s15_s7 }
   0x4   :  { %p49_p0 = scmp.ne.s32.totalorder %s15_s7, %s48_s8  ;;  %p54_p2 = scmp.lt.s32.totalorder %s48_s8, %s48_s8 }
   0x6   :  { %p55_p3 = por %p54_p2, %p53_p1 }
   0x8   :  { %p56_p4 = pnand %p55_p3, %p49_p0 }
   0xa   :  { %59 = shalt.err (!%p56_p4)
}
   0xb   :  { %17 = dma.hbm_to_vmem [thread:$0]  %s102_s0, 128, %s15_s7, [#allocation3]  }
   0xc   :  { %80 = dma.done.wait [#allocation3], 128  }
   0xd   :  { %81 = vsyncadd [#allocation3], 4294967168  ;;  %s85_s11 = smov [#allocation5]   ;;  %v21_v0 = vld [vmem:[#allocation2] sm:$0xff] }
   0xe   :  { %s29_s12 = sshll.u32 %s85_s11, 4  ;;  %22 = vst [vmem:[#allocation5] sm:$0xff] %v21_v0  ;;  %s30_s12 = int_to_ptr.vmem [resolvable:$true] %s29_s12 }
   0xf   :  { %s60_s13 = scalar_lea.vmem %s30_s12, 128  ;;  %p65_p6 = scmp.lt.s32.totalorder %s30_s12, %s30_s12 }
  0x10   :  { %p61_p5 = scmp.ne.s32.totalorder %s30_s12, %s60_s13  ;;  %p66_p7 = scmp.lt.s32.totalorder %s60_s13, %s60_s13 }
  0x12   :  { %p67_p8 = por %p66_p7, %p65_p6 }
  0x14   :  { %p68_p9 = pnand %p67_p8, %p61_p5 }
  0x16   :  { %71 = shalt.err (!%p68_p9)
}
  0x17   :  { %32 = dma.vmem_to_hbm [thread:$0]  %s30_s12, 128, %s103_s1, [#allocation4]  }
  0x18   :  { %82 = dma.done.wait [#allocation4], 128  }
  0x19   :  { %83 = vsyncadd [#allocation4], 4294967168 }
  0x1a   :  { %36 = vsyncpa [#allocation3], 1 }
  0x1b   :  { %37 = vsyncpa [#allocation4], 1 }

// kernel: tpu_custom_call.1
= control target key start
LH: loop header
LB: loop body
LE: loop exit
PB: predicated region body
PF: predicated region fallthrough
CT: control target
= control target key end

     0   :  { %8 = vsyncpa [#allocation3], 0  ;;  %s205_s0 = inlined_call_operand.hbm [shape: f32[16,128], index: 0, kind: input, shape index: {}]   ;;  %s206_s1 = inlined_call_operand.vmem [shape: f32[1,128], index: 1, kind: input, shape index: {}]   ;;  %s207_s2 = inlined_call_operand.vmem [shape: f32[1,128], index: 2, kind: input, shape index: {}]   ;;  %s208_s3 = inlined_call_operand.hbm [shape: f32[16,128], index: 3, kind: output, shape index: {}]  }
   0x1   :  { %9 = vsyncpa [#allocation4], 0  ;;  %s163_s12 = smov [#allocation2]  }
   0x2   :  { %s15_s13 = sshll.u32 %s163_s12, 4  ;;  %s16_s13 = int_to_ptr.vmem [resolvable:$true] %s15_s13 }
   0x3   :  { %s127_s14 = scalar_lea.vmem %s16_s13, 256  ;;  %p132_p1 = scmp.lt.s32.totalorder %s16_s13, %s16_s13 }
   0x4   :  { %p128_p0 = scmp.ne.s32.totalorder %s16_s13, %s127_s14  ;;  %p133_p2 = scmp.lt.s32.totalorder %s127_s14, %s127_s14 }
   0x6   :  { %p134_p3 = por %p133_p2, %p132_p1 }
   0x8   :  { %p135_p4 = pnand %p134_p3, %p128_p0 }
   0xa   :  { %138 = shalt.err (!%p135_p4)
}
   0xb   :  { %s164_s15 = smov 128   ;;  %s165_s16 = smov 8  }
   0xc   :  { %21 = dma.hbm_to_vmem [thread:$0]  %s205_s0, 256, %s16_s13, [#allocation3], %s164_s15, %s164_s15, %s165_s16  }
   0xd   :  { %159 = dma.done.wait [#allocation3], 256  }
   0xe   :  { %160 = vsyncadd [#allocation3], 4294967040  ;;  %v29_v0 = vld [vmem:[#allocation2] sm:$0xff]  ;;  %v30_v1 = vld [vmem:[#allocation2 + $0x8] sm:$0xff]  ;;  %s166_s22 = smov [#allocation5]  }
   0xf   :  { %31 = vadd.xlane.f32.xlu0 %v29_v0  ;;  %v105_v27 = vld [vmem:[%s206_s1] ss:$0 sm:$0xff]  ;;  %s93_s23 = sshll.u32 %s166_s22, 4  ;;  %s94_s23 = int_to_ptr.vmem [resolvable:$true] %s93_s23 }
  0x10   :  { %v106_v29 = vld [vmem:[%s207_s2] ss:$0 sm:$0xff]  ;;  %s139_s24 = scalar_lea.vmem %s94_s23, 256  ;;  %p144_p6 = scmp.lt.s32.totalorder %s94_s23, %s94_s23 }
  0x11   :  { %p140_p5 = scmp.ne.s32.totalorder %s94_s23, %s139_s24  ;;  %p145_p7 = scmp.lt.s32.totalorder %s139_s24, %s139_s24 }
  0x13   :  { %33 = vadd.xlane.f32.xlu0 %v30_v1  ;;  %p146_p8 = por %p145_p7, %p144_p6 }
  0x15   :  { %p147_p9 = pnand %p146_p8, %p140_p5 }
  0x98   :  { %v32_v2 = vpop.xlane.xlu0 %31 }
  0x99   :  { %v36_v3 = vmul.f32 0.0078125, %v32_v2 }
  0x9b   :  { %v38_v4 = vsub.f32 %v29_v0, %v36_v3 }
  0x9c   :  { %v34_v5 = vpop.xlane.xlu0 %33 }
  0x9d   :  { %v37_v6 = vmul.f32 0.0078125, %v34_v5  ;;  %v40_v7 = vmul.f32 %v38_v4, %v38_v4 }
  0x9f   :  { %v39_v8 = vsub.f32 %v30_v1, %v37_v6  ;;  %42 = vadd.xlane.f32.xlu1 %v40_v7 }
  0xa1   :  { %v41_v9 = vmul.f32 %v39_v8, %v39_v8 }
  0xa3   :  { %44 = vadd.xlane.f32.xlu1 %v41_v9 }
 0x128   :  { %v43_v10 = vpop.xlane.xlu1 %42 }
 0x129   :  { %v46_v11 = vmul.f32 0.007874016, %v43_v10 }
 0x12b   :  { %111 = vrsqrt.f32 %v46_v11  ;;  %vm50_vm0 = vcmp.eq.f32.partialorder %v46_v11, inf  ;;  %v53_v16 = vand.u32 2147483648, %v46_v11  ;;  %vm52_vm1 = vcmp.eq.f32.partialorder %v46_v11, 0.0 }
 0x12c   :  { %v45_v12 = vpop.xlane.xlu1 %44 }
 0x12d   :  { %v47_v13 = vmul.f32 0.007874016, %v45_v12 }
 0x12f   :  { %113 = vrsqrt.f32 %v47_v13  ;;  %vm57_vm2 = vcmp.eq.f32.partialorder %v47_v13, inf  ;;  %v60_v22 = vand.u32 2147483648, %v47_v13  ;;  %vm59_vm3 = vcmp.eq.f32.partialorder %v47_v13, 0.0 }
 0x138   :  { %v112_v14 = vpop.eup %111 }
 0x139   :  { %v49_v15 = vmul.f32 %v112_v14, %v46_v11 }
 0x13b   :  { %v51_v17 = vsel %vm50_vm0, %v46_v11, %v49_v15 }
 0x13c   :  { %v114_v18 = vpop.eup %113  ;;  %v54_v19 = vsel %vm52_vm1, %v53_v16, %v51_v17 }
 0x13d   :  { %v62_v20 = vadd.f32 1e-06, %v54_v19  ;;  %v56_v21 = vmul.f32 %v114_v18, %v47_v13 }
 0x13f   :  { %115 = vrcp.f32 %v62_v20  ;;  %v58_v23 = vsel %vm57_vm2, %v47_v13, %v56_v21 }
 0x140   :  { %v61_v24 = vsel %vm59_vm3, %v60_v22, %v58_v23 }
 0x141   :  { %v63_v25 = vadd.f32 1e-06, %v61_v24 }
 0x143   :  { %117 = vrcp.f32 %v63_v25 }
 0x14c   :  { %v116_v26 = vpop.eup %115 }
 0x14d   :  { %v67_v28 = vmul.f32 %v116_v26, %v38_v4 }
 0x14f   :  { %v75_v30 = vmul.f32 %v105_v27, %v67_v28 }
 0x150   :  { %v118_v31 = vpop.eup %117 }
 0x151   :  { %v68_v32 = vmul.f32 %v118_v31, %v39_v8  ;;  %v84_v33 = vadd.f32 %v106_v29, %v75_v30 }
 0x153   :  { %v76_v34 = vmul.f32 %v105_v27, %v68_v32  ;;  %86 = vst [vmem:[#allocation5] sm:$0xff] %v84_v33 }
 0x155   :  { %v85_v35 = vadd.f32 %v106_v29, %v76_v34 }
 0x157   :  { %87 = vst [vmem:[#allocation5 + $0x8] sm:$0xff] %v85_v35 }
 0x158   :  { %150 = shalt.err (!%p147_p9)
}
 0x159   :  { %99 = dma.vmem_to_hbm [thread:$0]  %s94_s23, 256, %s208_s3, [#allocation4], %s164_s15, %s164_s15, %s165_s16  }
 0x15a   :  { %161 = dma.done.wait [#allocation4], 256  }
 0x15b   :  { %162 = vsyncadd [#allocation4], 4294967040 }
 0x15c   :  { %103 = vsyncpa [#allocation3], 1 }
 0x15d   :  { %104 = vsyncpa [#allocation4], 1 }

</bundles_post_ra>
